<compile_context>
chip_gen: v7x
topology: tpu7x:2x2x1
jax: 0.10.0
libtpu: 0.0.40
codegen_flags: <defaults>
</compile_context>

<pallas_src>
import functools

import jax
import jax.numpy as jnp
from jax.experimental import pallas as pl
from jax.experimental.pallas import tpu as pltpu


# ----------------------------- kernel --------------------------------------

def _fused_gcn_kernel(*refs, num_layers: int):
    """refs = (feature, edge, mask, [gamma, beta, w, b] * num_layers, out)."""
    feature_ref, edge_ref, mask_ref = refs[0], refs[1], refs[2]
    param_refs = refs[3:3 + 4 * num_layers]
    o_ref = refs[3 + 4 * num_layers]

    # Loaded once, resident in vregs/VMEM for the whole forward.
    mask = mask_ref[...]          # [N, 1] f32
    edge = edge_ref[...]          # [N, N] f32

    out = feature_ref[...] * mask  # initial masking: feature * mask

    for li in range(num_layers):
        gamma = param_refs[4 * li + 0][...]   # [1, in_dim]
        beta = param_refs[4 * li + 1][...]    # [1, in_dim]
        w = param_refs[4 * li + 2][...]       # [in_dim, out_dim(_padded)]
        b = param_refs[4 * li + 3][...]       # [1, out_dim(_padded)]

        # LayerNorm over last dim (PyTorch semantics: biased var, eps=1e-5).
        mean = jnp.mean(out, axis=-1, keepdims=True)
        centered = out - mean
        var = jnp.mean(centered * centered, axis=-1, keepdims=True)
        h = centered * jax.lax.rsqrt(var + 1e-5)
        h = h * gamma + beta
        h = h * mask                                    # norm(out) * mask

        # GCN layer: edge @ (h @ W) + b   (both matmuls on the MXU).
        hw = jnp.dot(h, w, preferred_element_type=jnp.float32)
        y = jnp.dot(edge, hw, preferred_element_type=jnp.float32)
        y = (y + b) * mask                              # layer(out, edge) * mask

        if li < num_layers - 1:
            y = jnp.tanh(y) * mask                      # activation(out) * mask
        out = y

    o_ref[...] = out.astype(o_ref.dtype)


# ----------------------------- wrapper -------------------------------------

_LANE = 128  # lane-dense padding target for the final (out_dim=1) output


def gcn_forward(feature, edge, mask, params):
    """params: list of dicts with keys gamma, beta, w, b (one per layer)."""
    n = feature.shape[0]
    num_layers = len(params)
    final_out_dim = params[-1]["w"].shape[1]
    out_pad = max(final_out_dim, _LANE)

    flat_args = [feature, edge, mask]
    flops = 0
    transcendentals = 0
    for li, p in enumerate(params):
        w, b = p["w"], p["b"]
        f_in, f_out = w.shape
        if li == num_layers - 1 and f_out < out_pad:
            # Zero-pad last layer so the kernel's final store is lane-dense;
            # padded columns come out exactly 0 and are sliced off below.
            w = jnp.pad(w, ((0, 0), (0, out_pad - f_out)))
            b = jnp.pad(b, ((0, 0), (0, out_pad - b.shape[1])))
        flat_args += [p["gamma"], p["beta"], w, b]
        flops += 2 * n * f_in * f_out + 2 * n * n * f_out
        transcendentals += n  # rsqrt per node (LayerNorm)
        if li < num_layers - 1:
            transcendentals += n * f_out  # tanh

    bytes_accessed = sum(int(a.size) * 4 for a in flat_args) + n * out_pad * 4

    kernel = functools.partial(_fused_gcn_kernel, num_layers=num_layers)
    vmem_spec = pl.BlockSpec(memory_space=pltpu.MemorySpace.VMEM)

    out = pl.pallas_call(
        kernel,
        out_shape=jax.ShapeDtypeStruct((n, out_pad), jnp.float32),
        in_specs=[vmem_spec] * len(flat_args),
        out_specs=vmem_spec,
        cost_estimate=pl.CostEstimate(
            flops=int(flops),
            transcendentals=int(transcendentals),
            bytes_accessed=int(bytes_accessed),
        ),
    )(*flat_args)

    return out[:, :final_out_dim]


# ----------------------------- reference -----------------------------------

def gcn_forward_ref(feature, edge, mask, params):
    out = feature * mask
    n_layers = len(params)
    for li, p in enumerate(params):
        mean = jnp.mean(out, axis=-1, keepdims=True)
        var = jnp.mean((out - mean) ** 2, axis=-1, keepdims=True)
        h = (out - mean) / jnp.sqrt(var + 1e-5) * p["gamma"] + p["beta"]
        h = h * mask
        y = (edge @ (h @ p["w"]) + p["b"]) * mask
        if li < n_layers - 1:
            y = jnp.tanh(y) * mask
        out = y
    return out


# ----------------------------- main ----------------------------------------

if __name__ == "__main__":
    key = jax.random.PRNGKey(0)
    N = 16                       # number of graph nodes
    num_features = [32, 16]      # -> layers (32,16), (16,1); norms LN(32), LN(16)

    dims = list(zip(num_features, num_features[1:] + [1]))

    # Deterministic parameter init (Xavier-uniform weights, zero bias,
    # LayerNorm gamma=1 / beta=0 as in torch defaults).
    params = []
    for in_dim, out_dim in dims:
        key, wk = jax.random.split(key)
        limit = (6.0 / (in_dim + out_dim)) ** 0.5
        w = jax.random.uniform(wk, (in_dim, out_dim), jnp.float32, -limit, limit)
        params.append({
            "gamma": jnp.ones((1, in_dim), jnp.float32),
            "beta": jnp.zeros((1, in_dim), jnp.float32),
            "w": w,
            "b": jnp.zeros((1, out_dim), jnp.float32),
        })

    key, fk, ek, mk = jax.random.split(key, 4)
    feature = jax.random.normal(fk, (N, num_features[0]), jnp.float32)
    edge = jax.random.uniform(ek, (N, N), jnp.float32)
    mask = (jax.random.uniform(mk, (N, 1)) > 0.25).astype(jnp.float32)

    out = gcn_forward(feature, edge, mask, params)
    out = jax.block_until_ready(out)

    ref = gcn_forward_ref(feature, edge, mask, params)
    assert out.shape == (N, 1), out.shape
    assert jnp.allclose(out, ref, atol=1e-4, rtol=1e-4), (
        "mismatch vs reference: %s" % jnp.max(jnp.abs(out - ref)))

    print("KERNEL_OK")
</pallas_src>

<mosaic_0001>
module attributes {stable_mosaic.version = 11 : i64} {
  func.func @_fused_gcn_kernel(%arg0: memref<16x32xf32, #tpu.memory_space<vmem>>, %arg1: memref<16x16xf32, #tpu.memory_space<vmem>>, %arg2: memref<16x1xf32, #tpu.memory_space<vmem>>, %arg3: memref<1x32xf32, #tpu.memory_space<vmem>>, %arg4: memref<1x32xf32, #tpu.memory_space<vmem>>, %arg5: memref<32x16xf32, #tpu.memory_space<vmem>>, %arg6: memref<1x16xf32, #tpu.memory_space<vmem>>, %arg7: memref<1x16xf32, #tpu.memory_space<vmem>>, %arg8: memref<1x16xf32, #tpu.memory_space<vmem>>, %arg9: memref<16x128xf32, #tpu.memory_space<vmem>>, %arg10: memref<1x128xf32, #tpu.memory_space<vmem>>, %arg11: memref<16x128xf32, #tpu.memory_space<vmem>>) attributes {dimension_semantics = [], scalar_prefetch = 0 : i64, scratch_operands = 0 : i64, tpu.core_type = #tpu.core_type<tc>} {
    %c0 = arith.constant 0 : index
    %c0_0 = arith.constant 0 : index
    %0 = vector.load %arg2[%c0, %c0_0] : memref<16x1xf32, #tpu.memory_space<vmem>>, vector<16x1xf32>
    %c0_1 = arith.constant 0 : index
    %c0_2 = arith.constant 0 : index
    %1 = vector.load %arg1[%c0_1, %c0_2] : memref<16x16xf32, #tpu.memory_space<vmem>>, vector<16x16xf32>
    %c0_3 = arith.constant 0 : index
    %c0_4 = arith.constant 0 : index
    %2 = vector.load %arg0[%c0_3, %c0_4] : memref<16x32xf32, #tpu.memory_space<vmem>>, vector<16x32xf32>
    %3 = vector.broadcast %0 : vector<16x1xf32> to vector<16x32xf32>
    %4 = arith.mulf %2, %3 : vector<16x32xf32>
    %c0_5 = arith.constant 0 : index
    %c0_6 = arith.constant 0 : index
    %5 = vector.load %arg3[%c0_5, %c0_6] : memref<1x32xf32, #tpu.memory_space<vmem>>, vector<1x32xf32>
    %c0_7 = arith.constant 0 : index
    %c0_8 = arith.constant 0 : index
    %6 = vector.load %arg4[%c0_7, %c0_8] : memref<1x32xf32, #tpu.memory_space<vmem>>, vector<1x32xf32>
    %c0_9 = arith.constant 0 : index
    %c0_10 = arith.constant 0 : index
    %7 = vector.load %arg5[%c0_9, %c0_10] : memref<32x16xf32, #tpu.memory_space<vmem>>, vector<32x16xf32>
    %c0_11 = arith.constant 0 : index
    %c0_12 = arith.constant 0 : index
    %8 = vector.load %arg6[%c0_11, %c0_12] : memref<1x16xf32, #tpu.memory_space<vmem>>, vector<1x16xf32>
    %cst = arith.constant dense<0.000000e+00> : vector<16xf32>
    %9 = vector.multi_reduction <add>, %4, %cst [1] : vector<16x32xf32> to vector<16xf32>
    %10 = vector.shape_cast %9 : vector<16xf32> to vector<16x1xf32>
    %cst_13 = arith.constant 3.200000e+01 : f32
    %11 = vector.broadcast %cst_13 : f32 to vector<16x1xf32>
    %12 = arith.divf %10, %11 : vector<16x1xf32>
    %13 = vector.broadcast %12 : vector<16x1xf32> to vector<16x32xf32>
    %14 = arith.subf %4, %13 : vector<16x32xf32>
    %15 = arith.mulf %14, %14 : vector<16x32xf32>
    %cst_14 = arith.constant dense<0.000000e+00> : vector<16xf32>
    %16 = vector.multi_reduction <add>, %15, %cst_14 [1] : vector<16x32xf32> to vector<16xf32>
    %17 = vector.shape_cast %16 : vector<16xf32> to vector<16x1xf32>
    %cst_15 = arith.constant 3.200000e+01 : f32
    %18 = vector.broadcast %cst_15 : f32 to vector<16x1xf32>
    %19 = arith.divf %17, %18 : vector<16x1xf32>
    %cst_16 = arith.constant 9.99999974E-6 : f32
    %20 = vector.broadcast %cst_16 : f32 to vector<16x1xf32>
    %21 = arith.addf %19, %20 : vector<16x1xf32>
    %22 = math.rsqrt %21 : vector<16x1xf32>
    %23 = vector.broadcast %22 : vector<16x1xf32> to vector<16x32xf32>
    %24 = arith.mulf %14, %23 : vector<16x32xf32>
    %25 = vector.broadcast %5 : vector<1x32xf32> to vector<16x32xf32>
    %26 = arith.mulf %24, %25 : vector<16x32xf32>
    %27 = vector.broadcast %6 : vector<1x32xf32> to vector<16x32xf32>
    %28 = arith.addf %26, %27 : vector<16x32xf32>
    %29 = vector.broadcast %0 : vector<16x1xf32> to vector<16x32xf32>
    %30 = arith.mulf %28, %29 : vector<16x32xf32>
    %cst_17 = arith.constant dense<0.000000e+00> : vector<16x16xf32>
    %31 = tpu.matmul %30, %7, %cst_17 {dimension_numbers = #tpu.dot_dimension_numbers<[1], [0], [0], [1], [0, 0, 1, 1], [], []>} : vector<16x32xf32>, vector<32x16xf32>, vector<16x16xf32> -> vector<16x16xf32>
    %cst_18 = arith.constant dense<0.000000e+00> : vector<16x16xf32>
    %32 = tpu.matmul %1, %31, %cst_18 {dimension_numbers = #tpu.dot_dimension_numbers<[1], [0], [0], [1], [0, 0, 1, 1], [], []>} : vector<16x16xf32>, vector<16x16xf32>, vector<16x16xf32> -> vector<16x16xf32>
    %33 = vector.broadcast %8 : vector<1x16xf32> to vector<16x16xf32>
    %34 = arith.addf %32, %33 : vector<16x16xf32>
    %35 = vector.broadcast %0 : vector<16x1xf32> to vector<16x16xf32>
    %36 = arith.mulf %34, %35 : vector<16x16xf32>
    %37 = math.tanh %36 : vector<16x16xf32>
    %38 = vector.broadcast %0 : vector<16x1xf32> to vector<16x16xf32>
    %39 = arith.mulf %37, %38 : vector<16x16xf32>
    %c0_19 = arith.constant 0 : index
    %c0_20 = arith.constant 0 : index
    %40 = vector.load %arg7[%c0_19, %c0_20] : memref<1x16xf32, #tpu.memory_space<vmem>>, vector<1x16xf32>
    %c0_21 = arith.constant 0 : index
    %c0_22 = arith.constant 0 : index
    %41 = vector.load %arg8[%c0_21, %c0_22] : memref<1x16xf32, #tpu.memory_space<vmem>>, vector<1x16xf32>
    %c0_23 = arith.constant 0 : index
    %c0_24 = arith.constant 0 : index
    %42 = vector.load %arg9[%c0_23, %c0_24] : memref<16x128xf32, #tpu.memory_space<vmem>>, vector<16x128xf32>
    %c0_25 = arith.constant 0 : index
    %c0_26 = arith.constant 0 : index
    %43 = vector.load %arg10[%c0_25, %c0_26] : memref<1x128xf32, #tpu.memory_space<vmem>>, vector<1x128xf32>
    %cst_27 = arith.constant dense<0.000000e+00> : vector<16xf32>
    %44 = vector.multi_reduction <add>, %39, %cst_27 [1] : vector<16x16xf32> to vector<16xf32>
    %45 = vector.shape_cast %44 : vector<16xf32> to vector<16x1xf32>
    %cst_28 = arith.constant 1.600000e+01 : f32
    %46 = vector.broadcast %cst_28 : f32 to vector<16x1xf32>
    %47 = arith.divf %45, %46 : vector<16x1xf32>
    %48 = vector.broadcast %47 : vector<16x1xf32> to vector<16x16xf32>
    %49 = arith.subf %39, %48 : vector<16x16xf32>
    %50 = arith.mulf %49, %49 : vector<16x16xf32>
    %cst_29 = arith.constant dense<0.000000e+00> : vector<16xf32>
    %51 = vector.multi_reduction <add>, %50, %cst_29 [1] : vector<16x16xf32> to vector<16xf32>
    %52 = vector.shape_cast %51 : vector<16xf32> to vector<16x1xf32>
    %cst_30 = arith.constant 1.600000e+01 : f32
    %53 = vector.broadcast %cst_30 : f32 to vector<16x1xf32>
    %54 = arith.divf %52, %53 : vector<16x1xf32>
    %cst_31 = arith.constant 9.99999974E-6 : f32
    %55 = vector.broadcast %cst_31 : f32 to vector<16x1xf32>
    %56 = arith.addf %54, %55 : vector<16x1xf32>
    %57 = math.rsqrt %56 : vector<16x1xf32>
    %58 = vector.broadcast %57 : vector<16x1xf32> to vector<16x16xf32>
    %59 = arith.mulf %49, %58 : vector<16x16xf32>
    %60 = vector.broadcast %40 : vector<1x16xf32> to vector<16x16xf32>
    %61 = arith.mulf %59, %60 : vector<16x16xf32>
    %62 = vector.broadcast %41 : vector<1x16xf32> to vector<16x16xf32>
    %63 = arith.addf %61, %62 : vector<16x16xf32>
    %64 = vector.broadcast %0 : vector<16x1xf32> to vector<16x16xf32>
    %65 = arith.mulf %63, %64 : vector<16x16xf32>
    %cst_32 = arith.constant dense<0.000000e+00> : vector<16x128xf32>
    %66 = tpu.matmul %65, %42, %cst_32 {dimension_numbers = #tpu.dot_dimension_numbers<[1], [0], [0], [1], [0, 0, 1, 1], [], []>} : vector<16x16xf32>, vector<16x128xf32>, vector<16x128xf32> -> vector<16x128xf32>
    %cst_33 = arith.constant dense<0.000000e+00> : vector<16x128xf32>
    %67 = tpu.matmul %1, %66, %cst_33 {dimension_numbers = #tpu.dot_dimension_numbers<[1], [0], [0], [1], [0, 0, 1, 1], [], []>} : vector<16x16xf32>, vector<16x128xf32>, vector<16x128xf32> -> vector<16x128xf32>
    %68 = vector.broadcast %43 : vector<1x128xf32> to vector<16x128xf32>
    %69 = arith.addf %67, %68 : vector<16x128xf32>
    %70 = vector.broadcast %0 : vector<16x1xf32> to vector<16x128xf32>
    %71 = arith.mulf %69, %70 : vector<16x128xf32>
    %c0_34 = arith.constant 0 : index
    %c0_35 = arith.constant 0 : index
    %72 = vector.load %arg11[%c0_34, %c0_35] : memref<16x128xf32, #tpu.memory_space<vmem>>, vector<16x128xf32>
    tpu.vector_store %arg11[%c0_34, %c0_35], %71 {strides = array<i32>} : memref<16x128xf32, #tpu.memory_space<vmem>>, vector<16x128xf32>,
    return
  }
}

</mosaic_0001>

<bundles_post_ra>
// kernel: tpu_custom_call.1
= control target key start
LH: loop header
LB: loop body
LE: loop exit
PB: predicated region body
PF: predicated region fallthrough
CT: control target
= control target key end

     0   :  { %s808_s0 = inlined_call_operand.vmem [shape: f32[16,32], index: 0, kind: input, shape index: {}]   ;;  %s809_s1 = inlined_call_operand.vmem [shape: f32[16,16], index: 1, kind: input, shape index: {}]   ;;  %s810_s2 = inlined_call_operand.vmem [shape: f32[16,1], index: 2, kind: input, shape index: {}]   ;;  %s811_s3 = inlined_call_operand.vmem [shape: f32[1,32], index: 3, kind: input, shape index: {}]   ;;  %s812_s4 = inlined_call_operand.vmem [shape: f32[1,32], index: 4, kind: input, shape index: {}]   ;;  %s813_s5 = inlined_call_operand.vmem [shape: f32[32,16], index: 5, kind: input, shape index: {}]   ;;  %s814_s6 = inlined_call_operand.vmem [shape: f32[1,16], index: 6, kind: input, shape index: {}]   ;;  %s815_s7 = inlined_call_operand.vmem [shape: f32[1,16], index: 7, kind: input, shape index: {}]   ;;  %s816_s8 = inlined_call_operand.vmem [shape: f32[1,16], index: 8, kind: input, shape index: {}]   ;;  %s817_s9 = inlined_call_operand.vmem [shape: f32[16,128], index: 9, kind: input, shape index: {}]   ;;  %s818_s10 = inlined_call_operand.vmem [shape: f32[1,128], index: 10, kind: input, shape index: {}]   ;;  %s819_s11 = inlined_call_operand.hbm [shape: f32[16,128], index: 11, kind: output, shape index: {}]  }
   0x1   :  { %v39_v0 = vld [vmem:[%s810_s2] sm:$0xff] }
   0x2   :  { %16 = vsyncpa [#allocation3], 0  ;;  %v642_v1 = vmov 0   ;;  %v40_v2 = vld [vmem:[%s810_s2 + $0x8] sm:$0xff]  ;;  %v43_v3 = vld [vmem:[%s808_s0] sm:$0xff]  ;;  %vm64_vm0 = vcmask 261120  }
   0x3   :  { %605 = vset.pattern.permute.xlu0 %v642_v1  ;;  %v44_v6 = vld [vmem:[%s808_s0 + $0x8] sm:$0xff]  ;;  %v59_v21 = vld [vmem:[%s813_s5] sm:$0xff]  ;;  %v61_v23 = vld [vmem:[%s813_s5 + $0x10] sm:$0xff]  ;;  %vm197_vm1 = vcmask 130048  }
   0x4   :  { %47 = vperm.xlu0 %605, %v39_v0   ;;  %v60_v22 = vld [vmem:[%s813_s5 + $0x8] sm:$0xff]  ;;  %v62_v25 = vld [vmem:[%s813_s5 + $0x18] sm:$0xff]  ;;  %v517_v34 = vld [vmem:[%s811_s3] ss:$0 sm:$0xff] }
   0x5   :  { %v581_v24 = vpack.c.bf16 %v60_v22, %v59_v21  ;;  %v585_v26 = vpack.c.bf16 %v62_v25, %v61_v23  ;;  %v518_v36 = vld [vmem:[%s812_s4] ss:$0 sm:$0xff]  ;;  %v758_v49 = vld [vmem:[%s809_s1 + $0x8] sm:$0xff] }
   0x6   :  { %v41_v45 = vld [vmem:[%s809_s1] sm:$0xff] }
   0x7   :  { %582 = vmatprep.subr.bf16.mxu0 %v581_v24  ;;  %564 = vmatprep.mubr.msk.f32.mxu1 %vm197_vm1, %v41_v45  ;;  %v521_v50 = vld [vmem:[%s814_s6] ss:$0 sm:$0xff] }
   0x8   :  { %52 = vperm.xlu0 %605, %v40_v2   ;;  %584 = vmatpush3.bf16.msra.mxu0 %v581_v24  ;;  %v524_v21 = vld [vmem:[%s815_s7] ss:$0 sm:$0xff] }
   0x9   :  { %586 = vmatprep.subr.bf16.mxu0 %v585_v26  ;;  %v525_v23 = vld [vmem:[%s816_s8] ss:$0 sm:$0xff] }
   0xc   :  { %588 = vmatpush3.bf16.msra.mxu0 %v585_v26 }
  0x83   :  { %v715_v4 = vpop.permute.xlu0 %47 }
  0x84   :  { %v55_v5 = vmul.f32 %v715_v4, %v43_v3 }
  0x86   :  { %v65_v7 = vsel %vm64_vm0, %v55_v5, 0.0 }
  0x87   :  { %66 = vadd.xlane.f32.xlu1 %v65_v7  ;;  %v722_v8 = vpop.permute.xlu0 %52 }
  0x88   :  { %v56_v9 = vmul.f32 %v722_v8, %v44_v6 }
  0x8a   :  { %v68_v10 = vsel %vm64_vm0, %v56_v9, 0.0 }
  0x8b   :  { %69 = vadd.xlane.f32.xlu1 %v68_v10 }
 0x114   :  { %v67_v11 = vpop.xlane.xlu1 %66 }
 0x115   :  { %v72_v12 = vmul.f32 0.03125, %v67_v11  ;;  %v287_v11 = vld [vmem:[%s817_s9] sm:$0xff] }
 0x117   :  { %v74_v13 = vsub.f32 %v55_v5, %v72_v12  ;;  %v288_v12 = vld [vmem:[%s817_s9 + $0x8] sm:$0xff]  ;;  %s643_s9 = smov [#allocation2]  }
 0x118   :  { %v70_v14 = vpop.xlane.xlu1 %69  ;;  %s506_s0 = sshll.u32 %s643_s9, 4  ;;  %s507_s0 = int_to_ptr.vmem [resolvable:$true] %s506_s0 }
 0x119   :  { %v73_v15 = vmul.f32 0.03125, %v70_v14  ;;  %v76_v16 = vmul.f32 %v74_v13, %v74_v13  ;;  %s618_s2 = scalar_lea.vmem %s507_s0, 256  ;;  %p623_p1 = scmp.lt.s32.totalorder %s507_s0, %s507_s0 }
 0x11a   :  { %p619_p0 = scmp.ne.s32.totalorder %s507_s0, %s618_s2  ;;  %p624_p2 = scmp.lt.s32.totalorder %s618_s2, %s618_s2 }
 0x11b   :  { %v75_v17 = vsub.f32 %v56_v9, %v73_v15  ;;  %v78_v18 = vsel %vm64_vm0, %v76_v16, 0.0 }
 0x11c   :  { %79 = vadd.xlane.f32.xlu0 %v78_v18  ;;  %p625_p3 = por %p624_p2, %p623_p1 }
 0x11d   :  { %v77_v19 = vmul.f32 %v75_v17, %v75_v17 }
 0x11e   :  { %p626_p4 = pnand %p625_p3, %p619_p0 }
 0x11f   :  { %v81_v20 = vsel %vm64_vm0, %v77_v19, 0.0 }
 0x120   :  { %82 = vadd.xlane.f32.xlu1 %v81_v20 }
 0x1a9   :  { %v80_v27 = vpop.xlane.xlu0 %79 }
 0x1aa   :  { %v84_v28 = vmul.f32 0.03125, %v80_v27 }
 0x1ac   :  { %v86_v29 = vadd.f32 1e-05, %v84_v28 }
 0x1ad   :  { %v83_v30 = vpop.xlane.xlu1 %82 }
 0x1ae   :  { %606 = vrsqrt.f32 %v86_v29  ;;  %v85_v31 = vmul.f32 0.03125, %v83_v30 }
 0x1b0   :  { %v87_v32 = vadd.f32 1e-05, %v85_v31 }
 0x1b2   :  { %608 = vrsqrt.f32 %v87_v32 }
 0x1b8   :  { %v607_v33 = vpop.eup %606 }
 0x1b9   :  { %v90_v35 = vmul.f32 %v607_v33, %v74_v13  ;;  %v593_v13 = vpack.c.bf16 %v288_v12, %v287_v11 }
 0x1bb   :  { %v98_v37 = vmul.f32 %v517_v34, %v90_v35  ;;  %v528_v35 = vld [vmem:[%s818_s10] ss:$0 sm:$0xff] }
 0x1bc   :  { %v609_v38 = vpop.eup %608 }
 0x1bd   :  { %v91_v39 = vmul.f32 %v609_v38, %v75_v17  ;;  %v106_v40 = vadd.f32 %v518_v36, %v98_v37 }
 0x1bf   :  { %v99_v41 = vmul.f32 %v517_v34, %v91_v39  ;;  %v108_v42 = vmul.f32 %v106_v40, %v715_v4 }
 0x1c1   :  { %v107_v43 = vadd.f32 %v518_v36, %v99_v41  ;;  %557 = vmatprep.mubr.msk.f32.mxu0 %vm64_vm0, %v108_v42 }
 0x1c3   :  { %v109_v44 = vmul.f32 %v107_v43, %v722_v8 }
 0x1c5   :  { %558 = vmatmul.mubr.msk.f32.vlgmr.msra.gmra.mrb[0].mxu0 %vm64_vm0, %v109_v44 }
 0x1c6   :  { %578 = vmatprep.mubr.msk.f32.mxu0 %vm197_vm1, %v41_v45 }
 0x298   :  { %v559_v46 = vpop.f32.mrb[0].mxu0 }
 0x299   :  { %v182_v47 = vpop.f32.mrb[1].mxu0 }
 0x29a   :  { %v589_v48 = vpack.c.bf16 %v559_v46, %v182_v47 }
 0x29c   :  { %590 = vmatprep.subr.bf16.mxu1 %v589_v48 }
 0x29d   :  { %592 = vmatpush3.bf16.msra.mxu1 %v589_v48 }
 0x29e   :  { %594 = vmatprep.subr.bf16.mxu1 %v593_v13 }
 0x2a0   :  { %565 = vmatmul.mubr.msk.f32.vlgmr.msra.gmra.mrb[0].mxu1 %vm197_vm1, %v758_v49 }
 0x2a1   :  { %596 = vmatpush3.bf16.msra.mxu1 %v593_v13 }
 0x373   :  { %v566_v51 = vpop.f32.mrb[0].mxu1 }
 0x374   :  { %v276_v52 = vadd.f32 %v566_v51, %v521_v50  ;;  %v270_v53 = vpop.f32.mrb[1].mxu1 }
 0x375   :  { %v271_v54 = vadd.f32 %v521_v50, %v270_v53 }
 0x376   :  { %v280_v55 = vmul.f32 %v276_v52, %v722_v8 }
 0x377   :  { %v279_v56 = vmul.f32 %v271_v54, %v715_v4 }
 0x378   :  { %610 = vtanh.f32 %v280_v55 }
 0x379   :  { %612 = vtanh.f32 %v279_v56 }
 0x382   :  { %v611_v57 = vpop.eup %610 }
 0x383   :  { %v613_v58 = vpop.eup %612  ;;  %v284_v61 = vmul.f32 %v611_v57, %v722_v8 }
 0x384   :  { %v283_v59 = vmul.f32 %v613_v58, %v715_v4 }
 0x385   :  { %v293_v62 = vsel %vm197_vm1, %v284_v61, 0.0 }
 0x386   :  { %v290_v60 = vsel %vm197_vm1, %v283_v59, 0.0 }
 0x387   :  { %291 = vadd.xlane.f32.xlu1 %v290_v60 }
 0x38b   :  { %294 = vadd.xlane.f32.xlu1 %v293_v62 }
 0x414   :  { %v292_v63 = vpop.xlane.xlu1 %291 }
 0x415   :  { %v297_v0 = vmul.f32 0.0625, %v292_v63 }
 0x417   :  { %v299_v1 = vsub.f32 %v283_v59, %v297_v0 }
 0x418   :  { %v295_v2 = vpop.xlane.xlu1 %294 }
 0x419   :  { %v298_v3 = vmul.f32 0.0625, %v295_v2  ;;  %v301_v5 = vmul.f32 %v299_v1, %v299_v1 }
 0x41b   :  { %v300_v6 = vsub.f32 %v284_v61, %v298_v3  ;;  %v303_v7 = vsel %vm197_vm1, %v301_v5, 0.0 }
 0x41c   :  { %304 = vadd.xlane.f32.xlu1 %v303_v7 }
 0x41d   :  { %v302_v9 = vmul.f32 %v300_v6, %v300_v6 }
 0x41f   :  { %v306_v10 = vsel %vm197_vm1, %v302_v9, 0.0 }
 0x420   :  { %307 = vadd.xlane.f32.xlu1 %v306_v10 }
 0x4a9   :  { %v305_v14 = vpop.xlane.xlu1 %304 }
 0x4aa   :  { %v309_v15 = vmul.f32 0.0625, %v305_v14 }
 0x4ac   :  { %v311_v16 = vadd.f32 1e-05, %v309_v15 }
 0x4ad   :  { %v308_v17 = vpop.xlane.xlu1 %307 }
 0x4ae   :  { %614 = vrsqrt.f32 %v311_v16  ;;  %v310_v18 = vmul.f32 0.0625, %v308_v17 }
 0x4b0   :  { %v312_v19 = vadd.f32 1e-05, %v310_v18 }
 0x4b2   :  { %616 = vrsqrt.f32 %v312_v19 }
 0x4b8   :  { %v615_v20 = vpop.eup %614 }
 0x4b9   :  { %v315_v22 = vmul.f32 %v615_v20, %v299_v1 }
 0x4bb   :  { %v323_v24 = vmul.f32 %v524_v21, %v315_v22 }
 0x4bc   :  { %v617_v25 = vpop.eup %616 }
 0x4bd   :  { %v316_v26 = vmul.f32 %v617_v25, %v300_v6  ;;  %v331_v27 = vadd.f32 %v525_v23, %v323_v24 }
 0x4bf   :  { %v324_v28 = vmul.f32 %v524_v21, %v316_v26  ;;  %v333_v29 = vmul.f32 %v331_v27, %v715_v4 }
 0x4c1   :  { %v332_v30 = vadd.f32 %v525_v23, %v324_v28  ;;  %571 = vmatprep.mubr.msk.f32.mxu1 %vm197_vm1, %v333_v29 }
 0x4c3   :  { %v334_v31 = vmul.f32 %v332_v30, %v722_v8 }
 0x4c5   :  { %572 = vmatmul.mubr.msk.f32.vlgmr.msra.gmra.mrb[2].mxu1 %vm197_vm1, %v334_v31 }
 0x598   :  { %v573_v32 = vpop.f32.mrb[2].mxu1 }
 0x599   :  { %v407_v33 = vpop.f32.mrb[3].mxu1 }
 0x59a   :  { %v597_v34 = vpack.c.bf16 %v573_v32, %v407_v33 }
 0x59c   :  { %598 = vmatprep.subr.bf16.mxu0 %v597_v34 }
 0x59d   :  { %600 = vmatpush3.bf16.msra.mxu0 %v597_v34 }
 0x5a0   :  { %579 = vmatmul.mubr.msk.f32.vlgmr.msra.gmra.mrb[2].mxu0 %vm197_vm1, %v758_v49 }
 0x673   :  { %v580_v36 = vpop.f32.mrb[2].mxu0 }
 0x674   :  { %v494_v37 = vadd.f32 %v580_v36, %v528_v35  ;;  %v488_v38 = vpop.f32.mrb[3].mxu0 }
 0x675   :  { %v489_v39 = vadd.f32 %v528_v35, %v488_v38 }
 0x676   :  { %v498_v40 = vmul.f32 %v494_v37, %v722_v8 }
 0x677   :  { %v497_v41 = vmul.f32 %v489_v39, %v715_v4 }
 0x678   :  { %500 = vst [vmem:[#allocation2 + $0x8] sm:$0xff] %v498_v40 }
 0x679   :  { %499 = vst [vmem:[#allocation2] sm:$0xff] %v497_v41 }
 0x67a   :  { %629 = shalt.err (!%p626_p4)
}
 0x67b   :  { %s630_s26 = scalar_lea.hbm %s819_s11, 256 }
 0x67c   :  { %p631_p5 = scmp.ne.s32.totalorder %s819_s11, %s630_s26  ;;  %p634_p6 = scmp.lt.u32.totalorder %s630_s26, %s819_s11 }
 0x67e   :  { %p636_p7 = pnand %p634_p6, %p631_p5 }
 0x680   :  { %639 = shalt.err (!%p636_p7)
}
 0x681   :  { %s644_s12 = smov 128   ;;  %s645_s13 = smov 8  }
 0x682   :  { %512 = dma.vmem_to_hbm [thread:$0]  %s507_s0, 256, %s819_s11, [#allocation3], %s644_s12, %s644_s12, %s645_s13  }
 0x683   :  { %640 = dma.done.wait [#allocation3], 256  }
 0x684   :  { %641 = vsyncadd [#allocation3], 4294967040 }
 0x685   :  { %516 = vsyncpa [#allocation3], 1 }

</bundles_post_ra>
